<compile_context>
chip_gen: v7x
topology: tpu7x:2x2x1
jax: 0.10.0
libtpu: 0.0.40
codegen_flags: <defaults>
</compile_context>

<pallas_src>
import functools
import math

import jax
import jax.numpy as jnp
from jax.experimental import pallas as pl
from jax.experimental.pallas import tpu as pltpu


def _kernel_vpu(x_ref, c_ref, o_ref):
    """k == 1 path (d % 128 == 0): pure VPU broadcast, ~3 ops per output element."""
    # x_ref: (tm, 1) f32 ; c_ref: (3, d) f32 rows = [weight, bias, nan] ; o_ref: (tm, d)
    x = x_ref[...]
    mask = jnp.isnan(x)                                    # (tm, 1)
    w = c_ref[0:1, :]
    b = c_ref[1:2, :]
    nan_row = c_ref[2:3, :]
    lin = x * w + b                                        # NaN rows stay NaN; select discards them
    o_ref[...] = jnp.where(mask, nan_row, lin).astype(o_ref.dtype)


def _kernel_mxu(x_ref, c_ref, o_ref, *, k, kp):
    """k > 1 path: block-diagonal expansion on the MXU.

    out[r, j*d:(j+1)*d] = nan_to_num(x[r, j]) * w + bias + isnan(x[r, j]) * (nan - bias)
    """
    # x_ref: (tm, k) f32 ; c_ref: (2*kp+1, C) packed constants ; o_ref: (tm, C)
    x = x_ref[...]
    mask = jnp.isnan(x)
    xc = jnp.where(mask, 0.0, x)                           # required: masked lanes feed the MXU acc
    mf = mask.astype(jnp.float32)
    w_bd = c_ref[0:k, :]                                   # (k, C)  block-diag(weight)
    nb_bd = c_ref[kp:kp + k, :]                            # (k, C)  block-diag(nan - bias)
    bias_row = c_ref[2 * kp:2 * kp + 1, :]                 # (1, C)  tiled bias
    acc = jnp.dot(xc, w_bd, preferred_element_type=jnp.float32)
    acc = acc + jnp.dot(mf, nb_bd, preferred_element_type=jnp.float32)
    o_ref[...] = (acc + bias_row).astype(o_ref.dtype)


def num_embedding_forward(x, weight, bias, nan_emb, *,
                          out_dtype=jnp.float32,
                          target_block_bytes=4 * 1024 * 1024):
    """x: (b, n); weight: (d, 1); bias: (d,); nan_emb: (d,). Returns (b, n, d).

    out_dtype=jnp.bfloat16 is the fast path (compute in f32, cast on store)."""
    b, n = x.shape
    d = int(nan_emb.shape[0])
    m = b * n

    w_flat = weight.reshape(d).astype(jnp.float32)
    b_flat = bias.reshape(d).astype(jnp.float32)
    nan_flat = nan_emb.reshape(d).astype(jnp.float32)

    # ---- lane-dense packing factor: fold k logical rows into one output row of
    #      width C = k*d (multiple of 128) so the output DMA is full-width.
    if d % 128 == 0:
        k = 1
    else:
        k = 128 // math.gcd(d, 128)
        # Block-diag constants cost 2*k*C*4 bytes of VMEM; guard pathological large odd d.
        if 2 * k * k * d * 4 > (8 << 20):
            # TODO(synk): tile the expansion over sub-blocks of k instead of giving up lane density.
            k = 1
    C = k * d

    # ---- pad (at most k-1) dummy rows so m % k == 0 instead of dropping lane density.
    x_flat = x.reshape(m).astype(jnp.float32)
    pad = (-m) % k
    if pad:
        x_flat = jnp.concatenate([x_flat, jnp.zeros((pad,), jnp.float32)])
    m_pad = m + pad
    m_rows = m_pad // k
    x_rows = x_flat.reshape(m_rows, k)                     # contiguous view of x

    # ---- parameters packed into a single constant array (one DMA, no re-fetch).
    if k == 1:
        consts = jnp.stack([w_flat, b_flat, nan_flat])     # (3, d)
        kernel = _kernel_vpu
    else:
        kp = ((k + 7) // 8) * 8                            # 8-aligned sections for clean slices
        eye = jnp.eye(k, dtype=jnp.float32)
        w_bd = (eye[:, :, None] * w_flat[None, None, :]).reshape(k, C)
        nb_bd = (eye[:, :, None] * (nan_flat - b_flat)[None, None, :]).reshape(k, C)
        consts = jnp.zeros((2 * kp + 1, C), jnp.float32)
        consts = consts.at[0:k].set(w_bd)
        consts = consts.at[kp:kp + k].set(nb_bd)
        consts = consts.at[2 * kp].set(jnp.tile(b_flat, k))
        kernel = functools.partial(_kernel_mxu, k=k, kp=kp)
    R = int(consts.shape[0])

    # ---- row tile sized off the f32 compute footprint; keep >= 2 tiles for 2-TC chips.
    out_row_bytes = C * jnp.dtype(out_dtype).itemsize
    f32_row_bytes = C * 4
    const_bytes = ((R + 7) // 8 * 8) * C * 4

    tm = max(8, int(target_block_bytes // f32_row_bytes) // 8 * 8)
    if m_rows >= 16:
        half = (((m_rows + 1) // 2) + 7) // 8 * 8
        tm = min(tm, half)

    def vmem_estimate(rows):
        return (2 * rows * out_row_bytes          # double-buffered output block
                + 2 * rows * k * 4                # double-buffered input block
                + 3 * rows * f32_row_bytes        # f32 intermediates (MXU accumulators etc.)
                + const_bytes + (4 << 20))        # packed params + headroom

    while tm > 8 and vmem_estimate(tm) > (44 << 20):
        tm = max(8, (tm // 2) // 8 * 8)
    if tm > m_rows:
        tm = m_rows                               # single full-extent block
    grid = (pl.cdiv(m_rows, tm),)
    vmem_limit = int(min(48 << 20, vmem_estimate(tm) + (8 << 20)))

    out = pl.pallas_call(
        kernel,
        out_shape=jax.ShapeDtypeStruct((m_rows, C), out_dtype),
        grid_spec=pltpu.PrefetchScalarGridSpec(
            num_scalar_prefetch=0,
            grid=grid,
            in_specs=[
                pl.BlockSpec((tm, k), lambda i: (i, 0)),   # x rows
                pl.BlockSpec((R, C), lambda i: (0, 0)),    # packed constants (constant block)
            ],
            out_specs=pl.BlockSpec((tm, C), lambda i: (i, 0)),
        ),
        compiler_params=pltpu.CompilerParams(
            dimension_semantics=("parallel",),
            vmem_limit_bytes=vmem_limit,
        ),
    )(x_rows, consts)

    # (m_rows, C) row-major == (m_pad, d) row-major -> reshape is free; slice drops pad rows.
    out = out.reshape(m_pad, d)
    if pad:
        out = out[:m]
    return out.reshape(b, n, d)


def _reference(x, weight, bias, nan_emb):
    d = nan_emb.shape[0]
    mask = jnp.isnan(x).astype(jnp.float32)[..., None]
    xc = jnp.nan_to_num(x)[..., None]
    lin = xc * weight.reshape(1, 1, d) + bias.reshape(1, 1, d)
    return lin * (1.0 - mask) + nan_emb.reshape(1, 1, d) * mask


if __name__ == "__main__":
    key = jax.random.PRNGKey(0)
    k_x, k_nan, k_w, k_b, k_x2, k_x3, kn2, kw2, kb2, k_x4 = jax.random.split(key, 10)

    # --- module config per the PyTorch spec: embedding_dim = 32, input (b, n) with NaNs
    b, n, d = 2, 8, 32
    nan_emb = jax.random.normal(k_nan, (d,), dtype=jnp.float32)
    weight = jax.random.normal(k_w, (d, 1), dtype=jnp.float32) * 0.1
    bias = jax.random.normal(k_b, (d,), dtype=jnp.float32) * 0.1

    x = jax.random.normal(k_x, (b, n), dtype=jnp.float32)
    x = x.at[0, 2].set(jnp.nan).at[1, 5].set(jnp.nan)

    out = jax.block_until_ready(num_embedding_forward(x, weight, bias, nan_emb))
    ref = _reference(x, weight, bias, nan_emb)
    assert out.shape == (b, n, d), out.shape
    assert jnp.allclose(out, ref, atol=1e-5, rtol=1e-5), "mismatch (MXU path)"

    # --- multi-block grid with a ragged last block (small tiles forced)
    b2, n2 = 2, 100
    x2 = jax.random.normal(k_x2, (b2, n2), dtype=jnp.float32)
    x2 = x2.at[0, 7].set(jnp.nan).at[1, 63].set(jnp.nan)
    out2 = jax.block_until_ready(
        num_embedding_forward(x2, weight, bias, nan_emb, target_block_bytes=8 * 128 * 4))
    assert jnp.allclose(out2, _reference(x2, weight, bias, nan_emb), atol=1e-5, rtol=1e-5), \
        "mismatch (ragged grid)"

    # --- m % k != 0: padded rows instead of dropping lane-dense packing
    b3, n3 = 3, 7
    x3 = jax.random.normal(k_x3, (b3, n3), dtype=jnp.float32)
    x3 = x3.at[1, 1].set(jnp.nan)
    out3 = jax.block_until_ready(num_embedding_forward(x3, weight, bias, nan_emb))
    assert out3.shape == (b3, n3, d), out3.shape
    assert jnp.allclose(out3, _reference(x3, weight, bias, nan_emb), atol=1e-5, rtol=1e-5), \
        "mismatch (padded rows)"

    # --- d % 128 == 0: k == 1 VPU-broadcast path, 2-tile grid
    d2 = 128
    nan2 = jax.random.normal(kn2, (d2,), dtype=jnp.float32)
    w2 = jax.random.normal(kw2, (d2, 1), dtype=jnp.float32) * 0.1
    bi2 = jax.random.normal(kb2, (d2,), dtype=jnp.float32) * 0.1
    x4 = jax.random.normal(k_x4, (2, 8), dtype=jnp.float32)
    x4 = x4.at[0, 0].set(jnp.nan)
    out4 = jax.block_until_ready(num_embedding_forward(x4, w2, bi2, nan2))
    assert jnp.allclose(out4, _reference(x4, w2, bi2, nan2), atol=1e-5, rtol=1e-5), \
        "mismatch (k == 1 path)"

    # --- bf16 fast path (halves HBM store traffic; compute stays f32)
    out_bf16 = jax.block_until_ready(
        num_embedding_forward(x, weight, bias, nan_emb, out_dtype=jnp.bfloat16))
    assert jnp.allclose(out_bf16.astype(jnp.float32), ref, atol=3e-2, rtol=3e-2), \
        "mismatch (bf16 output)"

    print("KERNEL_OK")
</pallas_src>

<mosaic_0001>
module attributes {stable_mosaic.version = 11 : i64} {
  func.func @_kernel_mxu(%arg0: i32, %arg1: memref<4x4xf32, #tpu.memory_space<vmem>>, %arg2: memref<17x128xf32, #tpu.memory_space<vmem>>, %arg3: memref<4x128xf32, #tpu.memory_space<vmem>>) attributes {dimension_semantics = [#tpu.dimension_semantics<parallel>], iteration_bounds = array<i64: 1>, scalar_prefetch = 0 : i64, scratch_operands = 0 : i64, tpu.core_type = #tpu.core_type<tc>, window_params = [{transform_indices = @transform_0, window_bounds = array<i64: 4, 4>}, {pipeline_mode = #tpu.pipeline_mode<synchronous>, transform_indices = @transform_1, window_bounds = array<i64: 17, 128>}, {transform_indices = @transform_2, window_bounds = array<i64: 4, 128>}]} {
    %c0 = arith.constant 0 : index
    %c0_0 = arith.constant 0 : index
    %0 = vector.load %arg1[%c0, %c0_0] : memref<4x4xf32, #tpu.memory_space<vmem>>, vector<4x4xf32>
    %1 = arith.cmpf one, %0, %0 : vector<4x4xf32>
    %cst = arith.constant 0.000000e+00 : f32
    %2 = vector.broadcast %cst : f32 to vector<4x4xf32>
    %3 = arith.select %1, %2, %0 : vector<4x4xi1>, vector<4x4xf32>
    %4 = arith.extui %1 : vector<4x4xi1> to vector<4x4xi32>
    %5 = arith.sitofp %4 : vector<4x4xi32> to vector<4x4xf32>
    %c0_1 = arith.constant 0 : index
    %c0_2 = arith.constant 0 : index
    %6 = vector.load %arg2[%c0_1, %c0_2] : memref<17x128xf32, #tpu.memory_space<vmem>>, vector<4x128xf32>
    %c8 = arith.constant 8 : index
    %c0_3 = arith.constant 0 : index
    %7 = vector.load %arg2[%c8, %c0_3] : memref<17x128xf32, #tpu.memory_space<vmem>>, vector<4x128xf32>
    %c16 = arith.constant 16 : index
    %c0_4 = arith.constant 0 : index
    %8 = vector.load %arg2[%c16, %c0_4] : memref<17x128xf32, #tpu.memory_space<vmem>>, vector<1x128xf32>
    %cst_5 = arith.constant dense<0.000000e+00> : vector<4x128xf32>
    %9 = tpu.matmul %3, %6, %cst_5 {dimension_numbers = #tpu.dot_dimension_numbers<[1], [0], [0], [1], [0, 0, 1, 1], [], []>} : vector<4x4xf32>, vector<4x128xf32>, vector<4x128xf32> -> vector<4x128xf32>
    %cst_6 = arith.constant dense<0.000000e+00> : vector<4x128xf32>
    %10 = tpu.matmul %5, %7, %cst_6 {dimension_numbers = #tpu.dot_dimension_numbers<[1], [0], [0], [1], [0, 0, 1, 1], [], []>} : vector<4x4xf32>, vector<4x128xf32>, vector<4x128xf32> -> vector<4x128xf32>
    %11 = arith.addf %9, %10 : vector<4x128xf32>
    %12 = vector.broadcast %8 : vector<1x128xf32> to vector<4x128xf32>
    %13 = arith.addf %11, %12 : vector<4x128xf32>
    %c0_7 = arith.constant 0 : index
    %c0_8 = arith.constant 0 : index
    %14 = vector.load %arg3[%c0_7, %c0_8] : memref<4x128xf32, #tpu.memory_space<vmem>>, vector<4x128xf32>
    tpu.vector_store %arg3[%c0_7, %c0_8], %13 {strides = array<i32>} : memref<4x128xf32, #tpu.memory_space<vmem>>, vector<4x128xf32>,
    return
  }
  func.func @transform_0(%arg0: i32) -> (i32, i32) {
    %c0_i32 = arith.constant 0 : i32
    %c0_i32_0 = arith.constant 0 : i32
    return %arg0, %c0_i32 : i32, i32
  }
  func.func @transform_1(%arg0: i32) -> (i32, i32) {
    %c0_i32 = arith.constant 0 : i32
    %c0_i32_0 = arith.constant 0 : i32
    %c0_i32_1 = arith.constant 0 : i32
    return %c0_i32, %c0_i32_0 : i32, i32
  }
  func.func @transform_2(%arg0: i32) -> (i32, i32) {
    %c0_i32 = arith.constant 0 : i32
    %c0_i32_0 = arith.constant 0 : i32
    return %arg0, %c0_i32 : i32, i32
  }
}

</mosaic_0001>

<bundles_post_ra>
// kernel: tpu_custom_call.1
= control target key start
LH: loop header
LB: loop body
LE: loop exit
PB: predicated region body
PF: predicated region fallthrough
CT: control target
= control target key end

     0   :  { %7 = vsyncpa [#allocation3], 0  ;;  %s386_s0 = inlined_call_operand.hbm [shape: f32[4,4], index: 0, kind: input, shape index: {}]   ;;  %s387_s1 = inlined_call_operand.hbm [shape: f32[17,128], index: 1, kind: input, shape index: {}]   ;;  %s388_s2 = inlined_call_operand.hbm [shape: f32[4,128], index: 2, kind: output, shape index: {}]  }
   0x1   :  { %8 = vsyncpa [#allocation6], 0 }
   0x2   :  { %9 = vsyncpa [#allocation4], 0  ;;  %s321_s9 = smov [#allocation2]   ;;  %s322_s11 = smov [#allocation5]  }
   0x3   :  { %s16_s10 = sshll.u32 %s321_s9, 4  ;;  %s25_s12 = sshll.u32 %s322_s11, 4  ;;  %s17_s10 = int_to_ptr.vmem [resolvable:$true] %s16_s10  ;;  %s343_s12 = int_to_ptr.vmem [resolvable:$true] %s25_s12 }
   0x4   :  { %s249_s15 = scalar_lea.hbm %s386_s0, 64 }
   0x5   :  { %p250_p0 = scmp.ne.s32.totalorder %s386_s0, %s249_s15  ;;  %p253_p1 = scmp.lt.u32.totalorder %s249_s15, %s386_s0 }
   0x7   :  { %p255_p2 = pnand %p253_p1, %p250_p0 }
   0x9   :  { %258 = shalt.err (!%p255_p2)
}
   0xa   :  { %s259_s20 = scalar_lea.vmem %s17_s10, 64  ;;  %p264_p4 = scmp.lt.s32.totalorder %s17_s10, %s17_s10 }
   0xb   :  { %p260_p3 = scmp.ne.s32.totalorder %s17_s10, %s259_s20  ;;  %p265_p5 = scmp.lt.s32.totalorder %s259_s20, %s259_s20 }
   0xd   :  { %p266_p6 = por %p265_p5, %p264_p4 }
   0xf   :  { %p267_p7 = pnand %p266_p6, %p260_p3 }
  0x11   :  { %270 = shalt.err (!%p267_p7)
}
  0x12   :  { %19 = dma.hbm_to_vmem [thread:$0]  %s386_s0, 64, %s17_s10, [#allocation3]  }
  0x13   :  { %s271_s25 = scalar_lea.hbm %s387_s1, 384 }
  0x14   :  { %p272_p8 = scmp.ne.s32.totalorder %s387_s1, %s271_s25  ;;  %p275_p9 = scmp.lt.u32.totalorder %s271_s25, %s387_s1 }
  0x16   :  { %p277_p10 = pnand %p275_p9, %p272_p8 }
  0x18   :  { %280 = shalt.err (!%p277_p10)
}
  0x19   :  { %s281_s30 = scalar_lea.vmem %s343_s12, 384  ;;  %p286_p12 = scmp.lt.s32.totalorder %s343_s12, %s343_s12 }
  0x1a   :  { %p282_p11 = scmp.ne.s32.totalorder %s343_s12, %s281_s30  ;;  %p287_p13 = scmp.lt.s32.totalorder %s281_s30, %s281_s30 }
  0x1c   :  { %p288_p0 = por %p287_p13, %p286_p12 }
  0x1e   :  { %p289_p1 = pnand %p288_p0, %p282_p11 }
  0x20   :  { %292 = shalt.err (!%p289_p1)
}
  0x21   :  { %s323_s0 = smov 128   ;;  %s324_s3 = smov 8  }
  0x22   :  { %31 = dma.hbm_to_vmem [thread:$0]  %s387_s1, 384, %s343_s12, [#allocation6], %s323_s0, %s323_s0, %s324_s3  }
  0x23   :  { %315 = dma.done.wait [#allocation3], 64  }
  0x24   :  { %316 = vsyncadd [#allocation3], 4294967232 }
  0x25   :  { %317 = dma.done.wait [#allocation6], 384  }
  0x26   :  { %318 = vsyncadd [#allocation6], 4294966912  ;;  %v325_v0 = vmov 0.0   ;;  %vm326_vm0 = vmmov 0   ;;  %vm50_vm1 = vcmask 1043456   ;;  %vm46_vm2 = vcmask 31744  }
  0x27   :  { %232 = vmatprep.subr.mxu0 %v325_v0  ;;  %237 = vmatprep.subr.mxu1 %v325_v0  ;;  %v44_v1 = vld [vmem:[#allocation5 + $0x8] sm:$0xf]  ;;  %v43_v2 = vld [vmem:[#allocation5] sm:$0xf]  ;;  %v38_v3 = vld [vmem:[#allocation2] sm:$0xf] }
  0x28   :  { %234 = vmatprep.mubr.msk.f32.mxu0 %vm326_vm0, %v325_v0  ;;  %239 = vmatprep.mubr.msk.f32.mxu1 %vm326_vm0, %v325_v0  ;;  %vm39_vm3 = vcmp.ne.f32.partialorder %v38_v3, %v38_v3  ;;  %v227_v7 = vld [vmem:[#allocation5 + $0x10] ss:$0 sm:$0xff]  ;;  %s327_s1 = smov [#allocation7]  }
  0x29   :  { %233 = vmatpush3.msk.msra.mxu0 %vm50_vm1, %v44_v1  ;;  %238 = vmatpush3.msk.msra.mxu1 %vm50_vm1, %v43_v2  ;;  %v222_v4 = vsel %vm39_vm3, 1.0, %v325_v0  ;;  %v40_v5 = vsel %vm39_vm3, 0.0, %v38_v3  ;;  %s212_s6 = sshll.u32 %s327_s1, 4  ;;  %s213_s6 = int_to_ptr.vmem [resolvable:$true] %s212_s6 }
  0x2a   :  { %235 = vmatmul.mubr.msk.f32.vlgmr.msra.gmra.mrb[0].mxu0 %vm46_vm2, %v222_v4  ;;  %240 = vmatmul.mubr.msk.f32.vlgmr.msra.gmra.mrb[0].mxu1 %vm46_vm2, %v40_v5  ;;  %s293_s7 = scalar_lea.vmem %s213_s6, 64  ;;  %p298_p3 = scmp.lt.s32.totalorder %s213_s6, %s213_s6 }
  0x2b   :  { %p294_p2 = scmp.ne.s32.totalorder %s213_s6, %s293_s7  ;;  %p299_p4 = scmp.lt.s32.totalorder %s293_s7, %s293_s7 }
  0x2d   :  { %p300_p5 = por %p299_p4, %p298_p3 }
  0x2f   :  { %p301_p6 = pnand %p300_p5, %p294_p2 }
  0xfd   :  { %v120_v6 = vpop.f32.mrb[0].mxu0  ;;  %v196_v8 = vpop.f32.mrb[0].mxu1 }
  0xfe   :  { %v197_v9 = vadd.f32 %v196_v8, %v120_v6  ;;  %v236_v10 = vpop.f32.mrb[1].mxu0  ;;  %v241_v11 = vpop.f32.mrb[1].mxu1 }
 0x100   :  { %v204_v12 = vadd.f32 %v227_v7, %v197_v9 }
 0x102   :  { %205 = vst [vmem:[#allocation7] sm:$0xf] %v204_v12 }
 0x103   :  { %304 = shalt.err (!%p301_p6)
}
 0x104   :  { %s305_s10 = scalar_lea.hbm %s388_s2, 64 }
 0x105   :  { %p306_p7 = scmp.ne.s32.totalorder %s388_s2, %s305_s10  ;;  %p309_p8 = scmp.lt.u32.totalorder %s305_s10, %s388_s2 }
 0x107   :  { %p311_p9 = pnand %p309_p8, %p306_p7 }
 0x109   :  { %314 = shalt.err (!%p311_p9)
}
 0x10a   :  { %215 = dma.vmem_to_hbm [thread:$0]  %s213_s6, 64, %s388_s2, [#allocation4]  }
 0x10b   :  { %319 = dma.done.wait [#allocation4], 64  }
 0x10c   :  { %320 = vsyncadd [#allocation4], 4294967232 }
 0x10d   :  { %219 = vsyncpa [#allocation3], 1 }
 0x10e   :  { %220 = vsyncpa [#allocation6], 1 }
 0x10f   :  { %221 = vsyncpa [#allocation4], 1 }

</bundles_post_ra>
